<compile_context>
chip_gen: v7x
topology: tpu7x:2x2x1
jax: 0.10.0
libtpu: 0.0.40
codegen_flags: <defaults>
</compile_context>

<pallas_src>
import functools

import jax
import jax.numpy as jnp
from jax.experimental import pallas as pl
from jax.experimental.pallas import tpu as pltpu


def _attention_kernel(g_ref, x_ref, wg_ref, wx_ref, bgx_ref, wp_ref, bp_ref,
                      o_ref, *, vpu_psi):
    # g_ref: (F_g, TS), x_ref: (F_l, TS) -- channels in sublanes, spatial in lanes.
    cd = wg_ref.dtype
    g1 = jnp.dot(wg_ref[...], g_ref[...].astype(cd),
                 preferred_element_type=jnp.float32)
    x1 = jnp.dot(wx_ref[...], x_ref[...].astype(cd),
                 preferred_element_type=jnp.float32)
    h = jnp.maximum(g1 + x1 + bgx_ref[...], 0.0)              # (F_int, TS) f32

    if vpu_psi:
        # Tiny F_int: single-row projection as VPU multiply + XLU sublane
        # reduce; avoids the vreg->MXU->FIFO round trip for a 1-row output.
        z = jnp.sum(h * wp_ref[...], axis=0, keepdims=True) + bp_ref[...]
    else:
        z = jnp.dot(wp_ref[...], h.astype(cd),
                    preferred_element_type=jnp.float32) + bp_ref[...]

    psi = 0.5 * jnp.tanh(0.5 * z) + 0.5                       # sigmoid (1 EUP op)
    # Mixed-precision gate: multiply in the input dtype (bf16 VALU on v6e/v7x).
    o_ref[...] = (x_ref[...] * psi.astype(x_ref.dtype)).astype(o_ref.dtype)


def attention_block_pallas(g, x, params, *, ts=None, compute_dtype=None):
    """g: (B, F_g, D, H, W), x: (B, F_l, D, H, W) -> (B, F_l, D, H, W)."""
    B, F_g, D, H, W = g.shape
    _, F_l, _, _, _ = x.shape
    wg, bg, wx, bx, wp, bp = params          # (Cout, Cin) weights, (Cout, 1) biases
    F_int = wg.shape[0]

    out_dtype = x.dtype
    if compute_dtype is None:
        compute_dtype = x.dtype

    # Free reshape: NCDHW -> (B, C, S).  No pad, no cast, no transpose.
    S = D * H * W
    g3 = g.reshape(B, F_g, S)
    x3 = x.reshape(B, F_l, S)

    g_elt = jnp.dtype(g.dtype).itemsize
    x_elt = jnp.dtype(x.dtype).itemsize
    o_elt = jnp.dtype(out_dtype).itemsize
    c_elt = jnp.dtype(compute_dtype).itemsize

    LANE = 128
    # ---- generation-aware VMEM cap (v7x: 64 MiB physical, v5e/v6e: 128 MiB) --
    try:
        vmem_phys = int(pltpu.get_tpu_info().vmem_capacity_bytes)
    except Exception:
        vmem_phys = 64 << 20                     # conservative fallback (v7x)
    vmem_cap = int(min(max(0.6 * vmem_phys, 16 << 20), 96 << 20))

    nbuf = 2                                     # double-buffered streamed tiles
    per_lane_stream = F_g * g_elt + F_l * (x_elt + o_elt)   # HBM-streamed bytes/lane
    per_lane_live = 3 * F_int * 4                # f32 intermediates (g1/x1/h) in flight
    weight_bytes = ((wg.size + wx.size + wp.size) * c_elt
                    + (bg.size + bp.size) * 4)
    headroom = 4 << 20                           # Mosaic internal scratch etc.

    if ts is None:
        ts_vmem = int((vmem_cap - weight_bytes - headroom)
                      // (nbuf * per_lane_stream + per_lane_live))
        ts_bw = int((2 << 20) // per_lane_stream)   # >= ~2 MiB streamed per step
        ts = min(ts_vmem, max(ts_bw, 8 * LANE))
    ts = max(LANE, (ts // LANE) * LANE)

    # v7x has 2 TensorCores: when B == 1, make the spatial axis supply >= 2
    # grid steps so both cores get work (cheap on single-TC v5e/v6e).
    if B == 1 and S > 2 * LANE:
        ts = min(ts, pl.cdiv(pl.cdiv(S, 2), LANE) * LANE)

    if ts >= S:
        ts = S                                   # full extent (always legal)

    grid = (B, pl.cdiv(S, ts))                   # partial boundary block is masked

    # Weights in compute dtype; biases post-accumulation in f32.
    wg_c = wg.astype(compute_dtype)
    wx_c = wx.astype(compute_dtype)
    bgx = (bg + bx).astype(jnp.float32)          # (F_int, 1)
    bp_c = bp.astype(jnp.float32)                # (1, 1)

    vpu_psi = F_int <= 128
    if vpu_psi:
        wp_arg = wp.astype(jnp.float32).T        # (F_int, 1) column for VPU path
    else:
        wp_arg = wp.astype(compute_dtype)        # (1, F_int) row for MXU path

    def stream_spec(c):
        # Squeeze the batch dim; kernel sees (c, ts), lane-dense last dim.
        return pl.BlockSpec((None, c, ts), lambda b, s: (b, 0, s))

    def full2d(r, c):
        # Weights/biases: pinned resident across the whole grid.
        return pl.BlockSpec((r, c), lambda b, s: (0, 0))

    wp_spec = full2d(F_int, 1) if vpu_psi else full2d(1, F_int)

    # VMEM budget: double-buffered streamed tiles + f32 intermediates + weights.
    tile_bytes = per_lane_stream * ts
    vmem_limit = int(min(nbuf * tile_bytes + per_lane_live * ts
                         + 2 * weight_bytes + headroom, vmem_cap))
    vmem_limit = max(vmem_limit, 16 << 20)

    kernel = functools.partial(_attention_kernel, vpu_psi=vpu_psi)

    out3 = pl.pallas_call(
        kernel,
        out_shape=jax.ShapeDtypeStruct((B, F_l, S), out_dtype),
        grid_spec=pltpu.PrefetchScalarGridSpec(
            num_scalar_prefetch=0,
            grid=grid,
            in_specs=[
                stream_spec(F_g),               # g tile       (F_g, ts)
                stream_spec(F_l),               # x tile       (F_l, ts)
                full2d(F_int, F_g),             # Wg           (F_int, F_g)
                full2d(F_int, F_l),             # Wx           (F_int, F_l)
                full2d(F_int, 1),               # bg + bx      (F_int, 1)
                wp_spec,                        # Wp           row or column
                full2d(1, 1),                   # bp           (1, 1)
            ],
            out_specs=stream_spec(F_l),         # out tile     (F_l, ts) lane-dense
        ),
        compiler_params=pltpu.CompilerParams(
            dimension_semantics=("parallel", "parallel"),
            vmem_limit_bytes=vmem_limit),
    )(g3, x3, wg_c, wx_c, bgx, wp_arg, bp_c)

    return out3.reshape(B, F_l, D, H, W)


def _fold_conv_bn(w, b, gamma, beta, mean, var, eps=1e-5):
    """Fold 1x1x1 Conv3d (w: (Cout, Cin), b: (Cout,)) with eval-mode BN into
    a (Cout, Cin) weight and (Cout, 1) bias."""
    s = gamma / jnp.sqrt(var + eps)                     # (Cout,)
    weight = w * s[:, None]                             # (Cout, Cin)
    bias = (b - mean) * s + beta                        # (Cout,)
    return weight.astype(jnp.float32), bias[:, None].astype(jnp.float32)


def make_params(key, F_g, F_l, F_int):
    ks = jax.random.split(key, 9)
    wg = jax.random.normal(ks[0], (F_int, F_g)) / jnp.sqrt(F_g)
    bwg = jax.random.normal(ks[1], (F_int,)) * 0.1
    wx = jax.random.normal(ks[2], (F_int, F_l)) / jnp.sqrt(F_l)
    bwx = jax.random.normal(ks[3], (F_int,)) * 0.1
    wp = jax.random.normal(ks[4], (1, F_int)) / jnp.sqrt(F_int)
    bwp = jax.random.normal(ks[5], (1,)) * 0.1

    def bn(k, c):
        k1, k2, k3, k4 = jax.random.split(k, 4)
        gamma = 1.0 + 0.1 * jax.random.normal(k1, (c,))
        beta = 0.1 * jax.random.normal(k2, (c,))
        mean = 0.1 * jax.random.normal(k3, (c,))
        var = jnp.abs(1.0 + 0.1 * jax.random.normal(k4, (c,)))
        return gamma, beta, mean, var

    ag, bg = _fold_conv_bn(wg, bwg, *bn(ks[6], F_int))
    ax, bx = _fold_conv_bn(wx, bwx, *bn(ks[7], F_int))
    ap, bp = _fold_conv_bn(wp, bwp, *bn(ks[8], 1))
    return ag, bg, ax, bx, ap, bp


def attention_block_ref(g, x, params):
    """Pure-JAX f32 reference with identical (folded-BN) semantics."""
    wg, bg, wx, bx, wp, bp = params
    gf = g.astype(jnp.float32)
    xf = x.astype(jnp.float32)
    g1 = jnp.einsum('bcdhw,ic->bidhw', gf, wg) + bg[:, 0][None, :, None, None, None]
    x1 = jnp.einsum('bcdhw,ic->bidhw', xf, wx) + bx[:, 0][None, :, None, None, None]
    h = jnp.maximum(g1 + x1, 0.0)
    z = jnp.einsum('bcdhw,ic->bidhw', h, wp) + bp[:, 0][None, :, None, None, None]
    psi = jax.nn.sigmoid(z)
    return xf * psi


if __name__ == "__main__":
    root = jax.random.PRNGKey(0)

    def run_case(B, F_g, F_l, F_int, D, H, W, ts, case_id):
        key = jax.random.fold_in(root, case_id)
        kg, kx, kp = jax.random.split(key, 3)
        g = jax.random.normal(kg, (B, F_g, D, H, W)).astype(jnp.bfloat16)
        x = jax.random.normal(kx, (B, F_l, D, H, W)).astype(jnp.bfloat16)
        params = make_params(kp, F_g, F_l, F_int)

        out = jax.block_until_ready(attention_block_pallas(g, x, params, ts=ts))
        ref = attention_block_ref(g, x, params)

        assert out.shape == (B, F_l, D, H, W)
        out_f = out.astype(jnp.float32)
        assert jnp.allclose(out_f, ref, atol=2e-2, rtol=2e-2), \
            float(jnp.max(jnp.abs(out_f - ref)))

    # Case 1: B=2, tiny channels, S=512 -> auto tile (full extent), VPU psi path.
    run_case(2, 4, 4, 8, 8, 8, 8, ts=None, case_id=0)
    # Case 2: B=1, S=160 with ts=128 -> masked partial boundary block (no pad).
    run_case(1, 8, 4, 16, 4, 8, 5, ts=128, case_id=1)
    # Case 3: B=1, larger channels (F_int=256) -> MXU psi path + B==1 TC split.
    run_case(1, 128, 128, 256, 8, 8, 8, ts=None, case_id=2)

    print("KERNEL_OK")
</pallas_src>

<mosaic_0001>
module attributes {stable_mosaic.version = 11 : i64} {
  func.func @_attention_kernel(%arg0: i32, %arg1: i32, %arg2: memref<1x4x512xbf16, #tpu.memory_space<vmem>>, %arg3: memref<1x4x512xbf16, #tpu.memory_space<vmem>>, %arg4: memref<8x4xbf16, #tpu.memory_space<vmem>>, %arg5: memref<8x4xbf16, #tpu.memory_space<vmem>>, %arg6: memref<8x1xf32, #tpu.memory_space<vmem>>, %arg7: memref<8x1xf32, #tpu.memory_space<vmem>>, %arg8: memref<1x1xf32, #tpu.memory_space<vmem>>, %arg9: memref<1x4x512xbf16, #tpu.memory_space<vmem>>) attributes {dimension_semantics = [#tpu.dimension_semantics<parallel>, #tpu.dimension_semantics<parallel>], iteration_bounds = array<i64: 2, 1>, scalar_prefetch = 0 : i64, scratch_operands = 0 : i64, tpu.core_type = #tpu.core_type<tc>, window_params = [{transform_indices = @transform_0, window_bounds = array<i64: 1, 4, 512>}, {transform_indices = @transform_1, window_bounds = array<i64: 1, 4, 512>}, {pipeline_mode = #tpu.pipeline_mode<synchronous>, transform_indices = @transform_2, window_bounds = array<i64: 8, 4>}, {pipeline_mode = #tpu.pipeline_mode<synchronous>, transform_indices = @transform_3, window_bounds = array<i64: 8, 4>}, {pipeline_mode = #tpu.pipeline_mode<synchronous>, transform_indices = @transform_4, window_bounds = array<i64: 8, 1>}, {pipeline_mode = #tpu.pipeline_mode<synchronous>, transform_indices = @transform_5, window_bounds = array<i64: 8, 1>}, {pipeline_mode = #tpu.pipeline_mode<synchronous>, transform_indices = @transform_6, window_bounds = array<i64: 1, 1>}, {transform_indices = @transform_7, window_bounds = array<i64: 1, 4, 512>}]} {
    %c0 = arith.constant 0 : index
    %c0_0 = arith.constant 0 : index
    %0 = vector.load %arg4[%c0, %c0_0] : memref<8x4xbf16, #tpu.memory_space<vmem>>, vector<8x4xbf16>
    %c0_1 = arith.constant 0 : index
    %c0_2 = arith.constant 0 : index
    %c0_3 = arith.constant 0 : index
    %1 = vector.load %arg2[%c0_1, %c0_2, %c0_3] : memref<1x4x512xbf16, #tpu.memory_space<vmem>>, vector<1x4x512xbf16>
    %2 = vector.shape_cast %1 : vector<1x4x512xbf16> to vector<4x512xbf16>
    %cst = arith.constant dense<0.000000e+00> : vector<8x512xf32>
    %3 = tpu.matmul %0, %2, %cst {dimension_numbers = #tpu.dot_dimension_numbers<[1], [0], [0], [1], [0, 0, 1, 1], [], []>} : vector<8x4xbf16>, vector<4x512xbf16>, vector<8x512xf32> -> vector<8x512xf32>
    %c0_4 = arith.constant 0 : index
    %c0_5 = arith.constant 0 : index
    %4 = vector.load %arg5[%c0_4, %c0_5] : memref<8x4xbf16, #tpu.memory_space<vmem>>, vector<8x4xbf16>
    %c0_6 = arith.constant 0 : index
    %c0_7 = arith.constant 0 : index
    %c0_8 = arith.constant 0 : index
    %5 = vector.load %arg3[%c0_6, %c0_7, %c0_8] : memref<1x4x512xbf16, #tpu.memory_space<vmem>>, vector<1x4x512xbf16>
    %6 = vector.shape_cast %5 : vector<1x4x512xbf16> to vector<4x512xbf16>
    %cst_9 = arith.constant dense<0.000000e+00> : vector<8x512xf32>
    %7 = tpu.matmul %4, %6, %cst_9 {dimension_numbers = #tpu.dot_dimension_numbers<[1], [0], [0], [1], [0, 0, 1, 1], [], []>} : vector<8x4xbf16>, vector<4x512xbf16>, vector<8x512xf32> -> vector<8x512xf32>
    %8 = arith.addf %3, %7 : vector<8x512xf32>
    %c0_10 = arith.constant 0 : index
    %c0_11 = arith.constant 0 : index
    %9 = vector.load %arg6[%c0_10, %c0_11] : memref<8x1xf32, #tpu.memory_space<vmem>>, vector<8x1xf32>
    %10 = vector.broadcast %9 : vector<8x1xf32> to vector<8x512xf32>
    %11 = arith.addf %8, %10 : vector<8x512xf32>
    %cst_12 = arith.constant 0.000000e+00 : f32
    %12 = vector.broadcast %cst_12 : f32 to vector<8x512xf32>
    %13 = arith.maximumf %11, %12 : vector<8x512xf32>
    %c0_13 = arith.constant 0 : index
    %c0_14 = arith.constant 0 : index
    %14 = vector.load %arg7[%c0_13, %c0_14] : memref<8x1xf32, #tpu.memory_space<vmem>>, vector<8x1xf32>
    %15 = vector.broadcast %14 : vector<8x1xf32> to vector<8x512xf32>
    %16 = arith.mulf %13, %15 : vector<8x512xf32>
    %cst_15 = arith.constant dense<0.000000e+00> : vector<512xf32>
    %17 = vector.multi_reduction <add>, %16, %cst_15 [0] : vector<8x512xf32> to vector<512xf32>
    %18 = vector.shape_cast %17 : vector<512xf32> to vector<1x512xf32>
    %c0_16 = arith.constant 0 : index
    %c0_17 = arith.constant 0 : index
    %19 = vector.load %arg8[%c0_16, %c0_17] : memref<1x1xf32, #tpu.memory_space<vmem>>, vector<1x1xf32>
    %20 = vector.broadcast %19 : vector<1x1xf32> to vector<1x512xf32>
    %21 = arith.addf %18, %20 : vector<1x512xf32>
    %cst_18 = arith.constant 5.000000e-01 : f32
    %22 = vector.broadcast %cst_18 : f32 to vector<1x512xf32>
    %23 = arith.mulf %22, %21 : vector<1x512xf32>
    %24 = math.tanh %23 : vector<1x512xf32>
    %cst_19 = arith.constant 5.000000e-01 : f32
    %25 = vector.broadcast %cst_19 : f32 to vector<1x512xf32>
    %26 = arith.mulf %25, %24 : vector<1x512xf32>
    %cst_20 = arith.constant 5.000000e-01 : f32
    %27 = vector.broadcast %cst_20 : f32 to vector<1x512xf32>
    %28 = arith.addf %26, %27 : vector<1x512xf32>
    %c0_21 = arith.constant 0 : index
    %c0_22 = arith.constant 0 : index
    %c0_23 = arith.constant 0 : index
    %29 = vector.load %arg3[%c0_21, %c0_22, %c0_23] : memref<1x4x512xbf16, #tpu.memory_space<vmem>>, vector<1x4x512xbf16>
    %30 = vector.shape_cast %29 : vector<1x4x512xbf16> to vector<4x512xbf16>
    %31 = arith.truncf %28 : vector<1x512xf32> to vector<1x512xbf16>
    %32 = vector.broadcast %31 : vector<1x512xbf16> to vector<4x512xbf16>
    %33 = arith.mulf %30, %32 : vector<4x512xbf16>
    %c0_24 = arith.constant 0 : index
    %c0_25 = arith.constant 0 : index
    %c0_26 = arith.constant 0 : index
    %34 = vector.load %arg9[%c0_24, %c0_25, %c0_26] : memref<1x4x512xbf16, #tpu.memory_space<vmem>>, vector<1x4x512xbf16>
    %35 = vector.shape_cast %34 : vector<1x4x512xbf16> to vector<4x512xbf16>
    %36 = vector.shape_cast %33 : vector<4x512xbf16> to vector<1x4x512xbf16>
    tpu.vector_store %arg9[%c0_24, %c0_25, %c0_26], %36 {strides = array<i32>} : memref<1x4x512xbf16, #tpu.memory_space<vmem>>, vector<1x4x512xbf16>,
    return
  }
  func.func @transform_0(%arg0: i32, %arg1: i32) -> (i32, i32, i32) {
    %c0_i32 = arith.constant 0 : i32
    %c0_i32_0 = arith.constant 0 : i32
    return %arg0, %c0_i32, %arg1 : i32, i32, i32
  }
  func.func @transform_1(%arg0: i32, %arg1: i32) -> (i32, i32, i32) {
    %c0_i32 = arith.constant 0 : i32
    %c0_i32_0 = arith.constant 0 : i32
    return %arg0, %c0_i32, %arg1 : i32, i32, i32
  }
  func.func @transform_2(%arg0: i32, %arg1: i32) -> (i32, i32) {
    %c0_i32 = arith.constant 0 : i32
    %c0_i32_0 = arith.constant 0 : i32
    %c0_i32_1 = arith.constant 0 : i32
    return %c0_i32, %c0_i32_0 : i32, i32
  }
  func.func @transform_3(%arg0: i32, %arg1: i32) -> (i32, i32) {
    %c0_i32 = arith.constant 0 : i32
    %c0_i32_0 = arith.constant 0 : i32
    %c0_i32_1 = arith.constant 0 : i32
    return %c0_i32, %c0_i32_0 : i32, i32
  }
  func.func @transform_4(%arg0: i32, %arg1: i32) -> (i32, i32) {
    %c0_i32 = arith.constant 0 : i32
    %c0_i32_0 = arith.constant 0 : i32
    %c0_i32_1 = arith.constant 0 : i32
    return %c0_i32, %c0_i32_0 : i32, i32
  }
  func.func @transform_5(%arg0: i32, %arg1: i32) -> (i32, i32) {
    %c0_i32 = arith.constant 0 : i32
    %c0_i32_0 = arith.constant 0 : i32
    %c0_i32_1 = arith.constant 0 : i32
    return %c0_i32, %c0_i32_0 : i32, i32
  }
  func.func @transform_6(%arg0: i32, %arg1: i32) -> (i32, i32) {
    %c0_i32 = arith.constant 0 : i32
    %c0_i32_0 = arith.constant 0 : i32
    %c0_i32_1 = arith.constant 0 : i32
    return %c0_i32, %c0_i32_0 : i32, i32
  }
  func.func @transform_7(%arg0: i32, %arg1: i32) -> (i32, i32, i32) {
    %c0_i32 = arith.constant 0 : i32
    %c0_i32_0 = arith.constant 0 : i32
    return %arg0, %c0_i32, %arg1 : i32, i32, i32
  }
}

</mosaic_0001>

<bundles_post_ra>
// kernel: tpu_custom_call.1
= control target key start
LH: loop header
LB: loop body
LE: loop exit
PB: predicated region body
PF: predicated region fallthrough
CT: control target
= control target key end

     0   :  { %s1180_s0 = inlined_call_operand.vmem [shape: bf16[2,4,512], index: 0, kind: input, shape index: {}]   ;;  %s1181_s1 = inlined_call_operand.vmem [shape: bf16[2,4,512], index: 1, kind: input, shape index: {}]   ;;  %s1182_s2 = inlined_call_operand.vmem [shape: bf16[8,4], index: 2, kind: input, shape index: {}]   ;;  %s1183_s3 = inlined_call_operand.vmem [shape: bf16[8,4], index: 3, kind: input, shape index: {}]   ;;  %s1184_s4 = inlined_call_operand.vmem [shape: f32[8,1], index: 4, kind: input, shape index: {}]   ;;  %s1185_s5 = inlined_call_operand.vmem [shape: f32[8,1], index: 5, kind: input, shape index: {}]   ;;  %s1186_s6 = inlined_call_operand.<no memory space> [shape: f32[1,1], index: 6, kind: input, shape index: {}]   ;;  %s1187_s7 = inlined_call_operand.hbm [shape: bf16[2,4,512], index: 7, kind: output, shape index: {}]  }
   0x1   :  { %v12_v0 = vstv %s1186_s6 }
   0x2   :  { %13 = vst [vmem:[#allocation2] sm:$0x1] %v12_v0 }
   0x3   :  { %14 = vsyncpa [#allocation4], 0 }
   0x4   :  { %16 = vsyncpa [#allocation4 + $0x1], 0  ;;  %s1023_s26 = smov 0   ;;  %s1025_s27 = smov 0  }
   0x5   :  { %s1027_s28 = smov 0   ;;  %s1029_s29 = smov 0  }
   0x6   :  { %s1031_s30 = smov 0   ;;  %s1033_s8 = smov 0  }
   0x7 LB: > { %s800_s6 = sadd.s32 4294967295, %s975_s8   ;;  %s801_s9 = sadd.s32 4294967294, %s975_s8   ;;  %s975_s8 = sphi %s1033_s8, %s22_s8   ;;  %s971_s30 = sphi %s1031_s30, %s1194_s30   ;;  %s967_s29 = sphi %s1029_s29, %s1193_s29   ;;  %s963_s28 = sphi %s1027_s28, %s1192_s28   ;;  %s959_s27 = sphi %s1025_s27, %s1191_s27   ;;  %s955_s26 = sphi %s1023_s26, %s1190_s26  }
   0x8   : > { %s34_s10 = sadd.s32 1, %s971_s30  ;;  %s204_s11 = sadd.s32 1, %s963_s28 }
   0x9   : > { %p36_p0 = scmp.ge.s32.totalorder %s34_s10, 2  ;;  %p214_p1 = scmp.ne.s32.totalorder %s963_s28, %s959_s27 }
   0xa   : > { %p215_p2 = scmp.eq.s32.totalorder %s800_s6, 1  ;;  %p220_p3 = scmp.ne.s32.totalorder %s959_s27, %s955_s26 }
   0xb   : > { %s1196_s10 = smov (%p36_p0, %s34_s10), 0  ;;  %p221_p5 = scmp.eq.s32.totalorder %s801_s9, 1 }
   0xc   : > { %p1063_p4 = por %p215_p2, %p214_p1  ;;  %s199_s13 = ssub.s32 %s971_s30, %s1196_s10 }
   0xd   : > { %p804_p6 = scmp.ge.s32.totalorder %s975_s8, 1  ;;  %p202_p7 = scmp.eq.s32.totalorder %s199_s13, 0 }
   0xe   : > { %p1070_p8 = por %p221_p5, %p220_p3  ;;  %p280_p9 = scmp.lt.s32.totalorder %s975_s8, 3 }
   0xf   : > { %s1076_s15 = scalar_select %p202_p7, %s963_s28, %s204_s11  }
  0x10   : > { %p281_p10 = pnand %p804_p6, %p280_p9 }
  0x11   : > { %p326_p11 = scmp.lt.s32.totalorder (!%p281_p10), %s967_s29, 1  ;;  %v356_v1 = vlaneseq (!%p281_p10)  ;;  %v583_v2 = vld [vmem:[%s1184_s4] sm:$0xff] (!%p281_p10)  ;;  %v977_v3 = vmov (!%p281_p10), 1983009808   ;;  %v978_v5 = vmov (!%p281_p10), 0   ;;  %vm373_vm0 = vcmask (!%p281_p10), 1041408  }
  0x12   : > { %284 = sbr.rel (%p281_p10) target bundleno = 323 (0x143), region = 48  ;;  %v354_v4 = vunpack.c.l.s4 (!%p281_p10), %v977_v3  ;;  %418 = vmatprep.mubr.bf16.mxu0 (!%p281_p10), %v978_v5  ;;  %459 = vmatprep.mubr.bf16.mxu1 (!%p281_p10), %v978_v5  ;;  %v631_v7 = vld [vmem:[#allocation2] sm:$0x1] (!%p281_p10)  ;;  %vm369_vm1 = vcmask (!%p281_p10), 31744   ;;  %s827_s20 = sshll.u32 (!%p281_p10), %s967_s29, 7 }
  0x13   : > { %v1083_v6 = vshrl.u32 (!%p281_p10), %v356_v1, 7  ;;  %885 = vset.pattern.permute.xlu0 (!%p281_p10), %v978_v5  ;;  %886 = vset.pattern.permute.xlu1 (!%p281_p10), %v978_v5  ;;  %v597_v9 = vld [vmem:[%s1185_s5] sm:$0xff] (!%p281_p10)  ;;  %s1133_s25 = scalar_lea.hbm (!%p281_p10), %s1187_s7, %s827_s20 }
  0x14   : > { %v355_v8 = vunpack.c.0.s8 (!%p281_p10), %v354_v4  ;;  %586 = vperm.xlu0 (!%p281_p10), %885, %v583_v2   ;;  %634 = vperm.xlu1 (!%p281_p10), %886, %v631_v7   ;;  %v349_v24 = vld [vmem:[%s1183_s3] sm:$0xf] (!%p281_p10) }
  0x15   : > { %v347_v28 = vld [vmem:[%s1182_s2] sm:$0xf] (!%p281_p10) }
  0x16   : > { %v1095_v10 = vsub.s32 (!%p281_p10), %v355_v8, %v1083_v6  ;;  %v639_v8 = vsub.s32 (!%p281_p10), 0, %v1083_v6 }
  0x18   : > { %600 = vperm.xlu0 (!%p281_p10), %885, %v597_v9  }
  0x19   : > { %s327_s18 = scalar_select %p326_p11, %s967_s29, 1 }
  0x1a   : > { %s979_s29 = smov [#allocation3]  }
  0x1b   : > { %s825_s19 = sshll.u32 %s327_s18, 3  ;;  %s322_s18 = sand.u32 1, %s959_s27  }
  0x1c   : > { %s333_s24 = scalar_lea.vmem %s1180_s0, %s825_s19  ;;  %s343_s9 = scalar_lea.vmem %s1181_s1, %s825_s19 }
  0x1d   : > { %v348_v11 = vld [vmem:[%s333_s24] sm:$0xff]  ;;  %s805_s19 = sshll.u32 %s322_s18, 3  ;;  %s690_s6 = scalar_lea.sflag [#allocation4], %s322_s18 }
  0x1e   : > { %v1097_v12 = vld [vmem:[%s343_s9] sm:$0xff]  ;;  %v469_v14 = vcombine.high %v348_v11, %v348_v11  ;;  %v476_v15 = vrot.slane %v348_v11, %v1095_v10  ;;  %s324_s21 = scalar_lea.vmem [#allocation3], %s805_s19  ;;  %s901_s11 = sshll.u32 %s979_s29, 4  ;;  %s902_s11 = int_to_ptr.vmem [resolvable:$false] %s901_s11 }
  0x1f   : > { %v359_v13 = vrot.slane %v1097_v12, %v1095_v10  ;;  %v352_v16 = vcombine.high %v1097_v12, %v1097_v12  ;;  %s706_s22 = sshll.u32 %s324_s21, 4  ;;  %s903_s13 = scalar_lea.vmem %s902_s11, 256  ;;  %s1135_s22 = int_to_ptr.vmem [resolvable:$true] %s706_s22 }
  0x20   : > { %v484_v20 = vcombine.high %v476_v15, %v476_v15  ;;  %v483_v21 = vrot.slane %v469_v14, %v1095_v10  ;;  %v490_v26 = vsel %vm373_vm0, %v476_v15, 0  ;;  %s897_s9 = scalar_lea.vmem %s1135_s22, 128  ;;  %p904_p1 = scmp.lt.s32.totalorder %s1135_s22, %s902_s11 }
  0x21   : > { %v367_v17 = vcombine.high %v359_v13, %v359_v13  ;;  %v375_v18 = vsel %vm373_vm0, %v359_v13, 0  ;;  %v366_v19 = vrot.slane %v352_v16, %v1095_v10  ;;  %p898_p12 = scmp.ne.s32.totalorder %s1135_s22, %s897_s9  ;;  %p905_p2 = scmp.lt.s32.totalorder %s903_s13, %s897_s9 }
  0x22   : > { %v485_v25 = vcombine.high %v483_v21, %v483_v21  ;;  %v496_v27 = vsel %vm373_vm0, %v483_v21, 0 }
  0x23   : > { %810 = vmatprep.subr.msk.bf16.mxu0 %vm373_vm0, %v367_v17  ;;  %v368_v22 = vcombine.high %v366_v19, %v366_v19  ;;  %v381_v23 = vsel %vm373_vm0, %v366_v19, 0  ;;  %p899_p13 = pnand %p898_p12, %p1063_p4  ;;  %p906_p3 = por %p905_p2, %p904_p1 }
  0x24   : > { %387 = vmatpush1.bf16.msra.mxu0 %v375_v18 }
  0x25   : > { %812 = vmatprep.subr.msk.bf16.mxu1 %vm373_vm0, %v368_v22  ;;  %814 = vmatprep.subr.msk.bf16.mxu0 %vm373_vm0, %v484_v20  ;;  %p900_p0 = pneg %p899_p13 }
  0x26   : > { %428 = vmatpush1.bf16.msra.mxu1 %v381_v23 }
  0x27   : > { %811 = vmatmul.mubr.msk.bf16.vlgmr.msra.gmra.mrb[0].mxu0 %vm369_vm1, %v349_v24  ;;  %816 = vmatprep.subr.msk.bf16.mxu1 %vm373_vm0, %v485_v25  ;;  %p907_p5 = pnand %p906_p3, %p900_p0 }
  0x28   : > { %502 = vmatpush1.bf16.msra.mxu0 %v490_v26  ;;  %533 = vmatprep.mubr.bf16.mxu0 %v978_v5 }
  0x29   : > { %813 = vmatmul.mubr.msk.bf16.vlgmr.msra.gmra.mrb[0].mxu1 %vm369_vm1, %v349_v24 }
  0x2a   : > { %543 = vmatpush1.bf16.msra.mxu1 %v496_v27  ;;  %574 = vmatprep.mubr.bf16.mxu1 %v978_v5 }
  0x2f   : > { %815 = vmatmul.mubr.msk.bf16.vlgmr.msra.gmra.mrb[4].mxu0 %vm369_vm1, %v347_v28 }
  0x31   : > { %817 = vmatmul.mubr.msk.bf16.vlgmr.msra.gmra.mrb[4].mxu1 %vm369_vm1, %v347_v28 }
  0x93   : > { %v587_v37 = vpop.permute.xlu0 %586  ;;  %v635_v13 = vpop.permute.xlu1 %634 }
  0x94   : > { %v640_v20 = vrot.slane %v635_v13, %v639_v8 }
  0x97   : > { %v601_v51 = vpop.permute.xlu0 %600 }
  0xfa   : > { %v420_v29 = vpop.f32.mrb[0].mxu0 }
  0xfb   : > { %v422_v30 = vpop.f32.mrb[1].mxu0 }
  0xfc   : > { %v424_v31 = vpop.f32.mrb[2].mxu0  ;;  %v461_v32 = vpop.f32.mrb[0].mxu1 }
  0xfd   : > { %v425_v33 = vpop.f32.mrb[3].mxu0  ;;  %v463_v34 = vpop.f32.mrb[1].mxu1 }
  0xfe   : > { %v465_v35 = vpop.f32.mrb[2].mxu1 }
  0xff   : > { %v466_v36 = vpop.f32.mrb[3].mxu1 }
 0x102   : > { %v535_v38 = vpop.f32.mrb[4].mxu0 }
 0x103   : > { %v536_v39 = vadd.f32 %v535_v38, %v420_v29  ;;  %v537_v40 = vpop.f32.mrb[5].mxu0 }
 0x104   : > { %v538_v41 = vadd.f32 %v537_v40, %v422_v30  ;;  %v539_v42 = vpop.f32.mrb[6].mxu0  ;;  %v576_v43 = vpop.f32.mrb[4].mxu1 }
 0x105   : > { %v589_v44 = vadd.f32 %v587_v37, %v536_v39  ;;  %v577_v45 = vadd.f32 %v576_v43, %v461_v32  ;;  %v540_v46 = vpop.f32.mrb[7].mxu0  ;;  %v578_v47 = vpop.f32.mrb[5].mxu1 }
 0x106   : > { %v590_v48 = vadd.f32 %v587_v37, %v538_v41  ;;  %v579_v49 = vadd.f32 %v578_v47, %v463_v34  ;;  %v580_v50 = vpop.f32.mrb[6].mxu1 }
 0x107   : > { %v591_v52 = vadd.f32 %v587_v37, %v577_v45  ;;  %v581_v53 = vpop.f32.mrb[7].mxu1  ;;  %v593_v54 = vmax.f32 %v589_v44, 0.0 }
 0x108   : > { %v592_v55 = vadd.f32 %v587_v37, %v579_v49  ;;  %v594_v56 = vmax.f32 %v590_v48, 0.0 }
 0x109   : > { %v595_v57 = vmax.f32 %v591_v52, 0.0  ;;  %v603_v58 = vmul.f32 %v601_v51, %v593_v54 }
 0x10a   : > { %v596_v59 = vmax.f32 %v592_v55, 0.0  ;;  %v604_v60 = vmul.f32 %v601_v51, %v594_v56 }
 0x10b   : > { %v605_v61 = vmul.f32 %v601_v51, %v595_v57  ;;  %v607_v62 = vrot.slane %v603_v58, 4 }
 0x10c   : > { %v606_v63 = vmul.f32 %v601_v51, %v596_v59  ;;  %v613_v0 = vrot.slane %v604_v60, 4 }
 0x10d   : > { %v608_v1 = vadd.f32 %v607_v62, %v603_v58  ;;  %v619_v2 = vrot.slane %v605_v61, 4 }
 0x10e   : > { %v614_v3 = vadd.f32 %v613_v0, %v604_v60  ;;  %v625_v4 = vrot.slane %v606_v63, 4 }
 0x10f   : > { %v609_v5 = vrot.slane %v608_v1, 2  ;;  %v620_v7 = vadd.f32 %v619_v2, %v605_v61 }
 0x110   : > { %v615_v9 = vrot.slane %v614_v3, 2  ;;  %v626_v11 = vadd.f32 %v625_v4, %v606_v63 }
 0x111   : > { %v610_v14 = vadd.f32 %v609_v5, %v608_v1  ;;  %v621_v15 = vrot.slane %v620_v7, 2 }
 0x112   : > { %v616_v16 = vadd.f32 %v615_v9, %v614_v3  ;;  %v627_v17 = vrot.slane %v626_v11, 2 }
 0x113   : > { %v611_v18 = vrot.slane %v610_v14, 1  ;;  %v622_v19 = vadd.f32 %v621_v15, %v620_v7 }
 0x114   : > { %v617_v21 = vrot.slane %v616_v16, 1  ;;  %v628_v22 = vadd.f32 %v627_v17, %v626_v11 }
 0x115   : > { %v612_v23 = vadd.f32 %v611_v18, %v610_v14  ;;  %v623_v24 = vrot.slane %v622_v19, 1 }
 0x116   : > { %v618_v25 = vadd.f32 %v617_v21, %v616_v16  ;;  %v629_v26 = vrot.slane %v628_v22, 1 }
 0x117   : > { %v624_v27 = vadd.f32 %v623_v24, %v622_v19  ;;  %v641_v28 = vadd.f32 %v640_v20, %v612_v23 }
 0x118   : > { %v630_v29 = vadd.f32 %v629_v26, %v628_v22  ;;  %v642_v6 = vadd.f32 %v640_v20, %v618_v25 }
 0x119   : > { %v643_v30 = vadd.f32 %v640_v20, %v624_v27  ;;  %v645_v31 = vmul.f32 0.5, %v641_v28 }
 0x11a   : > { %v644_v32 = vadd.f32 %v640_v20, %v630_v29  ;;  %v646_v33 = vmul.f32 0.5, %v642_v6 }
 0x11b   : > { %v647_v34 = vmul.f32 0.5, %v643_v30  ;;  %889 = vtanh.f32 %v645_v31 }
 0x11c   : > { %v648_v35 = vmul.f32 0.5, %v644_v32  ;;  %891 = vtanh.f32 %v646_v33 }
 0x11d   : > { %893 = vtanh.f32 %v647_v34 }
 0x11e   : > { %895 = vtanh.f32 %v648_v35 }
 0x125   : > { %v890_v36 = vpop.eup %889 }
 0x126   : > { %v892_v37 = vpop.eup %891  ;;  %v653_v38 = vmul.f32 0.5, %v890_v36 }
 0x127   : > { %v894_v39 = vpop.eup %893  ;;  %v654_v40 = vmul.f32 0.5, %v892_v37 }
 0x128   : > { %v896_v41 = vpop.eup %895  ;;  %v655_v42 = vmul.f32 0.5, %v894_v39  ;;  %v657_v43 = vadd.f32 0.5, %v653_v38 }
 0x129   : > { %v656_v44 = vmul.f32 0.5, %v896_v41  ;;  %v658_v45 = vadd.f32 0.5, %v654_v40 }
 0x12a   : > { %v659_v46 = vadd.f32 0.5, %v655_v42 }
 0x12b   : > { %v660_v47 = vadd.f32 0.5, %v656_v44  ;;  %v818_v48 = vpack.c.bf16 %v658_v45, %v657_v43 }
 0x12d   : > { %v819_v49 = vpack.c.bf16 %v660_v47, %v659_v46  ;;  %v677_v50 = vrot.slane %v818_v48, %v1095_v10 }
 0x12f   : > { %v684_v51 = vrot.slane %v819_v49, %v1095_v10 }
 0x131   : > { %v685_v52 = vcombine.low %v677_v50, %v684_v51 }
 0x133   : > { %v687_v53 = vmul.bf16 %v685_v52, %v1097_v12 }
 0x135   : > { %688 = vst [vmem:[%s324_s21] sm:$0xff] %v687_v53 }
 0x136   : > { %910 = shalt.err (!%p907_p5)
}
 0x137   : > { %s911_s16 = scalar_lea.hbm %s1133_s25, 128  ;;  %s915_s19 = scalar_lea.hbm %s1187_s7, 256 }
 0x138   : > { %p912_p6 = scmp.ne.s32.totalorder %s1133_s25, %s911_s16  ;;  %p916_p10 = scmp.lt.u32.totalorder %s1133_s25, %s1187_s7 }
 0x139   : > { %p917_p11 = scmp.lt.u32.totalorder %s915_s19, %s911_s16  ;;  %p919_p13 = scmp.lt.u32.totalorder %s911_s16, %s1133_s25 }
 0x13a   : > { %p913_p7 = pnand %p912_p6, %p1063_p4 }
 0x13b   : > { %p918_p12 = por %p917_p11, %p916_p10 }
 0x13c   : > { %p914_p9 = pneg %p913_p7 }
 0x13d   : > { %p920_p0 = por %p919_p13, %p918_p12 }
 0x13f   : > { %p921_p1 = pnand %p920_p0, %p914_p9 }
 0x141   : > { %924 = shalt.err (!%p921_p1)
}
 0x142   : > { %828 = dma.vmem_to_hbm [thread:$0]  (%p1063_p4), %s1135_s22, 128, %s1133_s25, %s690_s6  }
 0x143 PF: > { %p834_p2 = scmp.ge.s32.totalorder %s975_s8, 2  ;;  %s718_s23 = sand.u32 1, %s955_s26  }
 0x144   : > { %s719_s24 = scalar_lea.sflag [#allocation4], %s718_s23 }
 0x145   : > { %p831_p3 = pnand %p834_p2, %p1070_p8 }
 0x147   : > { %950 = dma.done.wait (!%p831_p3), %s719_s24, 128  }
 0x148   : > { %952 = vsyncadd (!%p831_p3), %s719_s24, 4294967168  ;;  %s22_s8 = sadd.s32 1, %s975_s8   ;;  %s1190_s26 = smov %s959_s27 }
 0x149   : > { %p19_p5 = scmp.ge.s32.totalorder %s22_s8, 4   ;;  %s1191_s27 = smov %s963_s28 }
 0x14a   : > { %s1192_s28 = smov %s1076_s15  ;;  %s1193_s29 = smov %s971_s30 }
 0x14b   : > { %s1194_s30 = smov %s1196_s10  ;;  %21 = sbr.rel (!%p19_p5) target bundleno = 7 (0x7), region = 86 }
 0x152   :  { %724 = vsyncpa [#allocation4], 1 }
 0x153   :  { %726 = vsyncpa [#allocation4 + $0x1], 1 }

</bundles_post_ra>
